<compile_context>
chip_gen: v7x
topology: tpu7x:2x2x1
jax: 0.10.0
libtpu: 0.0.40
codegen_flags: <defaults>
</compile_context>

<pallas_src>
import math
import functools

import jax
import jax.numpy as jnp
from jax.experimental import pallas as pl
from jax.experimental.pallas import tpu as pltpu

LN_EPS = 1e-5  # PyTorch nn.LayerNorm default


# ---------------------------------------------------------------------------
# Shared epilogue: residual + LayerNorm1 + ReLU-FFN + residual + LayerNorm2
# ---------------------------------------------------------------------------
def _post_attention(x_res, attn, w1_ref, b1_ref, w2_ref, b2_ref,
                    g1_ref, bt1_ref, g2_ref, bt2_ref, eps):
    x = x_res + attn                                    # dropout1 = identity (eval)
    mu = jnp.mean(x, axis=-1, keepdims=True)
    xc = x - mu
    var = jnp.mean(xc * xc, axis=-1, keepdims=True)
    x = xc * jax.lax.rsqrt(var + eps) * g1_ref[...] + bt1_ref[...]

    # FFN on the MXU in bf16 (weights pre-cast in the wrapper), f32 accumulate.
    h = jnp.dot(x.astype(jnp.bfloat16), w1_ref[...],
                preferred_element_type=jnp.float32) + b1_ref[...]
    h = jnp.maximum(h, 0.0)                             # ReLU; inner dropout = id
    y = jnp.dot(h.astype(jnp.bfloat16), w2_ref[...],
                preferred_element_type=jnp.float32) + b2_ref[...]
    x = x + y                                           # dropout2 = identity

    mu2 = jnp.mean(x, axis=-1, keepdims=True)
    xc2 = x - mu2
    var2 = jnp.mean(xc2 * xc2, axis=-1, keepdims=True)
    return xc2 * jax.lax.rsqrt(var2 + eps) * g2_ref[...] + bt2_ref[...]


def _write_outputs(out, o_ref, ps_ref):
    o_ref[...] = out.astype(o_ref.dtype)
    # Per-(b, q-block) row-sum, used by the wrapper for the final mean-pool so
    # the (B,S,D) layer output never has to be read back from HBM for pooling.
    rs = jnp.sum(out, axis=0, keepdims=True)[None]      # (1, 1, D)
    ps_ref[...] = jnp.broadcast_to(rs, ps_ref.shape).astype(ps_ref.dtype)


# ---------------------------------------------------------------------------
# Kernel bodies
# ---------------------------------------------------------------------------
def _single_step_kernel(*refs, scale, eps, add_pe):
    """Fast path: the whole kv sequence is one tile -> direct softmax."""
    if add_pe:
        (xq_ref, xkv_ref, peq_ref, pekv_ref, w1_ref, b1_ref, w2_ref, b2_ref,
         g1_ref, bt1_ref, g2_ref, bt2_ref, o_ref, ps_ref) = refs
    else:
        (xq_ref, xkv_ref, w1_ref, b1_ref, w2_ref, b2_ref,
         g1_ref, bt1_ref, g2_ref, bt2_ref, o_ref, ps_ref) = refs
        peq_ref = pekv_ref = None

    xq = xq_ref[...]
    kv = xkv_ref[...]
    if add_pe:
        xq = xq + peq_ref[...]
        kv = kv + pekv_ref[...]

    # Fold the softmax scale into q; bf16 operands, f32 accumulation, and a
    # last-dim contraction so k is never transposed/relayouted.
    q16 = (xq * scale).astype(jnp.bfloat16)
    kv16 = kv.astype(jnp.bfloat16)
    s = jax.lax.dot_general(q16, kv16, (((1,), (1,)), ((), ())),
                            preferred_element_type=jnp.float32)
    m = jnp.max(s, axis=-1, keepdims=True)
    p = jnp.exp(s - m)
    denom = jnp.sum(p, axis=-1, keepdims=True)
    attn = jnp.dot(p.astype(jnp.bfloat16), kv16,
                   preferred_element_type=jnp.float32)
    attn = attn * pl.reciprocal(denom, approx=True)

    out = _post_attention(xq, attn, w1_ref, b1_ref, w2_ref, b2_ref,
                          g1_ref, bt1_ref, g2_ref, bt2_ref, eps)
    _write_outputs(out, o_ref, ps_ref)


def _flash_kernel(*refs, scale, eps, add_pe):
    """General path: flash-style online softmax over the kv grid axis."""
    if add_pe:
        (xq_ref, xkv_ref, peq_ref, pekv_ref, w1_ref, b1_ref, w2_ref, b2_ref,
         g1_ref, bt1_ref, g2_ref, bt2_ref, o_ref, ps_ref,
         m_sc, l_sc, acc_sc) = refs
    else:
        (xq_ref, xkv_ref, w1_ref, b1_ref, w2_ref, b2_ref,
         g1_ref, bt1_ref, g2_ref, bt2_ref, o_ref, ps_ref,
         m_sc, l_sc, acc_sc) = refs
        peq_ref = pekv_ref = None

    ki = pl.program_id(2)
    nk = pl.num_programs(2)

    @pl.when(ki == 0)
    def _():
        m_sc[...] = jnp.full(m_sc.shape, -jnp.inf, jnp.float32)
        l_sc[...] = jnp.zeros(l_sc.shape, jnp.float32)
        acc_sc[...] = jnp.zeros(acc_sc.shape, jnp.float32)

    xq = xq_ref[...]
    kv = xkv_ref[...]
    if add_pe:
        xq = xq + peq_ref[...]
        kv = kv + pekv_ref[...]

    q16 = (xq * scale).astype(jnp.bfloat16)
    kv16 = kv.astype(jnp.bfloat16)
    s = jax.lax.dot_general(q16, kv16, (((1,), (1,)), ((), ())),
                            preferred_element_type=jnp.float32)

    # Online softmax (flash) update.
    m_prev = m_sc[...]
    m_new = jnp.maximum(m_prev, jnp.max(s, axis=-1, keepdims=True))
    alpha = jnp.exp(m_prev - m_new)
    p = jnp.exp(s - m_new)
    l_sc[...] = alpha * l_sc[...] + jnp.sum(p, axis=-1, keepdims=True)
    acc_sc[...] = alpha * acc_sc[...] + jnp.dot(
        p.astype(jnp.bfloat16), kv16, preferred_element_type=jnp.float32)
    m_sc[...] = m_new

    @pl.when(ki == nk - 1)
    def _():
        attn = acc_sc[...] * pl.reciprocal(l_sc[...], approx=True)
        out = _post_attention(xq, attn, w1_ref, b1_ref, w2_ref, b2_ref,
                              g1_ref, bt1_ref, g2_ref, bt2_ref, eps)
        _write_outputs(out, o_ref, ps_ref)


# ---------------------------------------------------------------------------
# Tiling / VMEM policy and the pallas_call wrapper
# ---------------------------------------------------------------------------
def _largest_tile(s, cap):
    """Largest t <= cap with s % t == 0 and t % 8 == 0 (sublane alignment).
    Falls back to the full dim s, which is always a legal block."""
    if s <= cap:
        return s
    for t in range(cap, 7, -1):
        if s % t == 0 and t % 8 == 0:
            return t
    # TODO(synk): pad odd/prime sequence lengths instead of a full-S tile.
    return s


def _vmem_bytes(tq, tk, d, dff, add_pe, flash):
    f32, bf16, nbuf = 4, 2, 2            # every BlockSpec ref is double-buffered
    xb = nbuf * (tq + tk) * d * f32 * (2 if add_pe else 1)   # x (+ pe) blocks
    wb = nbuf * (2 * d * dff * bf16 + (dff + 5 * d) * f32)   # weights & vectors
    ob = nbuf * (tq * d + 8 * d) * f32                       # output + row-sum
    sc = tq * (d + 2) * f32 if flash else 0                  # m/l/acc scratch
    tmp = tq * tk * (f32 + bf16) + tq * dff * f32 + 4 * tq * d * f32
    return xb + wb + ob + sc + tmp


def _fused_encoder_layer(x, pe, p, *, heads, eps=LN_EPS):
    """x: (B,S,D) f32; pe: (S,D) f32 or None (fused PE add).
    Returns (layer_output (B,S,D), per-q-block row sums (B, S//tq, 8, D))."""
    B, S, D = x.shape
    dff = p["w1"].shape[1]
    scale = 1.0 / math.sqrt(D // heads)   # heads only set the scale (per the spec)
    add_pe = pe is not None

    # Per-generation VMEM budget: ~0.8 x physical (~102 MiB v5e/v6e, ~51 MiB
    # v7x); fall back to a conservative 64 MiB figure if the query fails.
    try:
        phys = pltpu.get_tpu_info().vmem_capacity_bytes
    except Exception:
        phys = 64 * 1024 * 1024
    budget = int(phys * 0.8)

    tq = _largest_tile(S, 512)   # big tq = K/V-reuse knob (kv HBM reads ~ S/tq)
    tk = _largest_tile(S, 256)   # lane-dense score tile (>=128 when S allows)

    # Keep >= 2 blocks on the parallel axes so both v7x TensorCores get work.
    if B * (S // tq) < 2:
        t2 = _largest_tile(S, max(8, tq // 2))
        if t2 < S:
            tq = t2

    # Shrink against the VMEM budget (double-buffering included in the model).
    while _vmem_bytes(tq, tk, D, dff, add_pe, S // tk > 1) > budget:
        if tq >= tk:
            nt = _largest_tile(S, max(8, tq // 2))
            if nt >= tq:
                break
            tq = nt
        else:
            nt = _largest_tile(S, max(8, tk // 2))
            if nt >= tk:
                break
            tk = nt

    n_q, n_k = S // tq, S // tk
    flash = n_k > 1
    need = _vmem_bytes(tq, tk, D, dff, add_pe, flash)
    vmem_limit = int(min(budget, max(2 * need, 32 * 1024 * 1024)))

    # Weights go to bf16 once on the host side: half the DMA, native MXU dtype.
    w1b = p["w1"].astype(jnp.bfloat16)
    w2b = p["w2"].astype(jnp.bfloat16)

    def const_spec(a):
        nd = a.ndim
        return pl.BlockSpec(a.shape, lambda *_, _nd=nd: (0,) * _nd)

    param_args = (w1b, p["b1"], w2b, p["b2"],
                  p["g1"], p["bt1"], p["g2"], p["bt2"])
    param_specs = [const_spec(a) for a in param_args]

    out_shape = (jax.ShapeDtypeStruct((B, S, D), x.dtype),
                 jax.ShapeDtypeStruct((B, n_q, 8, D), jnp.float32))

    wbytes = 2 * D * dff * 2 + (dff + 5 * D) * 4
    cost = pl.CostEstimate(
        flops=int(4 * B * S * S * D + 4 * B * S * D * dff),
        transcendentals=int(B * S * S + 4 * B * S),
        bytes_accessed=int(4 * B * S * D * (2 + n_q) + wbytes))

    if not flash:
        grid = (B, n_q)
        in_specs = [pl.BlockSpec((None, tq, D), lambda b, qi: (b, qi, 0)),
                    pl.BlockSpec((None, S, D), lambda b, qi: (b, 0, 0))]
        call_args = [x, x]
        if add_pe:
            in_specs += [pl.BlockSpec((tq, D), lambda b, qi: (qi, 0)),
                         pl.BlockSpec((S, D), lambda b, qi: (0, 0))]
            call_args += [pe, pe]
        in_specs += param_specs
        call_args += list(param_args)
        out_specs = [pl.BlockSpec((None, tq, D), lambda b, qi: (b, qi, 0)),
                     pl.BlockSpec((None, 1, 8, D), lambda b, qi: (b, qi, 0, 0))]
        kernel = functools.partial(_single_step_kernel, scale=scale, eps=eps,
                                   add_pe=add_pe)
        scratch = []
        semantics = ("parallel", "parallel")
    else:
        grid = (B, n_q, n_k)
        in_specs = [pl.BlockSpec((None, tq, D), lambda b, qi, ki: (b, qi, 0)),
                    pl.BlockSpec((None, tk, D), lambda b, qi, ki: (b, ki, 0))]
        call_args = [x, x]
        if add_pe:
            in_specs += [pl.BlockSpec((tq, D), lambda b, qi, ki: (qi, 0)),
                         pl.BlockSpec((tk, D), lambda b, qi, ki: (ki, 0))]
            call_args += [pe, pe]
        in_specs += param_specs
        call_args += list(param_args)
        out_specs = [pl.BlockSpec((None, tq, D), lambda b, qi, ki: (b, qi, 0)),
                     pl.BlockSpec((None, 1, 8, D),
                                  lambda b, qi, ki: (b, qi, 0, 0))]
        kernel = functools.partial(_flash_kernel, scale=scale, eps=eps,
                                   add_pe=add_pe)
        scratch = [pltpu.VMEM((tq, 1), jnp.float32),   # running max
                   pltpu.VMEM((tq, 1), jnp.float32),   # running denominator
                   pltpu.VMEM((tq, D), jnp.float32)]   # running numerator
        semantics = ("parallel", "parallel", "arbitrary")

    y, ps = pl.pallas_call(
        kernel,
        out_shape=out_shape,
        grid_spec=pltpu.PrefetchScalarGridSpec(
            num_scalar_prefetch=0, grid=grid,
            in_specs=in_specs, out_specs=out_specs,
            scratch_shapes=scratch),
        compiler_params=pltpu.CompilerParams(
            dimension_semantics=semantics,
            vmem_limit_bytes=vmem_limit),
        cost_estimate=cost,
    )(*call_args)
    return y, ps


# ---------------------------------------------------------------------------
# Encoder layer wrapper (handles 'strided' mode) and full model forward
# ---------------------------------------------------------------------------
def _strided_perm(n_ctx, local_attn_ctx, blocksize):
    bT_ctx = n_ctx // local_attn_ctx
    assert bT_ctx % blocksize == 0, f"{bT_ctx}, {blocksize}"
    return jnp.arange(n_ctx).reshape(bT_ctx, local_attn_ctx).T.reshape(-1)


def encoder_layer_forward(x, pe, p, *, heads, attn_mode, local_attn_ctx=None,
                          blocksize=32):
    """x: (B,S,D).  Equivalent to the PyTorch layer applied to x.permute(1,0,2)
    and permuted back (those two permutes cancel and are never performed)."""
    if attn_mode == "strided":
        # Post-attention ops are row-wise, so the fused layer commutes with the
        # strided row permutation: permute, run, unpermute.
        # TODO(synk): fold the strided permutation into the q/kv/out index_maps
        # (strided BlockSpecs) instead of a wrapper-level gather/scatter.
        perm = _strided_perm(x.shape[1], local_attn_ctx, blocksize)
        inv = jnp.argsort(perm)
        pe_p = None if pe is None else pe[perm]
        y, ps = _fused_encoder_layer(x[:, perm, :], pe_p, p, heads=heads)
        return y[:, inv, :], ps          # row-sums are permutation invariant
    return _fused_encoder_layer(x, pe, p, heads=heads)


def model_forward(tokens, p, *, heads, attn_mode, local_attn_ctx=None,
                  blocksize=32, num_layers=1):
    """BinaryClassificationTransformerNorm1.forward (dropouts = identity)."""
    x = p["emb"][tokens]                                  # embedding lookup
    x = x.reshape(x.shape[0], -1, x.shape[-1])            # (B, S, D)
    S = x.shape[1]
    pe = p["pe"][:S]                                      # added inside layer 0
    ps = None
    for layer in range(num_layers):
        x, ps = encoder_layer_forward(
            x, pe if layer == 0 else None, p, heads=heads, attn_mode=attn_mode,
            local_attn_ctx=local_attn_ctx, blocksize=blocksize)
    pooled = jnp.sum(ps[:, :, 0, :], axis=1) / S          # == encoded.mean(dim=0)
    return pooled @ p["cls_w"] + p["cls_b"]               # classifier -> (B, 2)


# ---------------------------------------------------------------------------
# Parameters (deterministic init) and pure-JAX reference
# ---------------------------------------------------------------------------
def _positional_encoding_table(length, d_model):
    position = jnp.arange(length, dtype=jnp.float32)[:, None]
    div_term = jnp.exp(jnp.arange(0, d_model, 2, dtype=jnp.float32)
                       * (-math.log(10000.0) / d_model))
    pe = jnp.zeros((length, d_model), jnp.float32)
    pe = pe.at[:, 0::2].set(jnp.sin(position * div_term))
    pe = pe.at[:, 1::2].set(jnp.cos(position * div_term))
    return pe


def init_params(key, d_model, dim_feedforward, vocab=512, pe_len=5000):
    ks = jax.random.split(key, 8)
    return dict(
        emb=jax.random.normal(ks[0], (vocab, d_model), jnp.float32),
        pe=_positional_encoding_table(pe_len, d_model),
        w1=jax.random.normal(ks[1], (d_model, dim_feedforward), jnp.float32)
            / math.sqrt(d_model),
        b1=jax.random.normal(ks[2], (1, dim_feedforward), jnp.float32) * 0.02,
        w2=jax.random.normal(ks[3], (dim_feedforward, d_model), jnp.float32)
            / math.sqrt(dim_feedforward),
        b2=jax.random.normal(ks[4], (1, d_model), jnp.float32) * 0.02,
        g1=jnp.ones((1, d_model), jnp.float32),   # LayerNorm defaults
        bt1=jnp.zeros((1, d_model), jnp.float32),
        g2=jnp.ones((1, d_model), jnp.float32),
        bt2=jnp.zeros((1, d_model), jnp.float32),
        cls_w=jax.random.normal(ks[5], (d_model, 2), jnp.float32)
            / math.sqrt(d_model),
        cls_b=jax.random.normal(ks[6], (2,), jnp.float32) * 0.02,
        # NOTE: linear0 (2 -> d_model) is declared in the PyTorch __init__ but
        # never used in forward(); it is omitted here.
    )


def _ref_layernorm(x, g, b, eps=LN_EPS):
    mu = jnp.mean(x, axis=-1, keepdims=True)
    var = jnp.mean((x - mu) ** 2, axis=-1, keepdims=True)
    return (x - mu) / jnp.sqrt(var + eps) * g + b


def _ref_strided_transpose(x, n_ctx, local_attn_ctx, blocksize):
    bT_ctx = n_ctx // local_attn_ctx
    assert bT_ctx % blocksize == 0, f"{bT_ctx}, {blocksize}"
    n, t, embd = x.shape
    return x.reshape(n, bT_ctx, local_attn_ctx, embd).transpose(0, 2, 1, 3).reshape(n, t, embd)


def _ref_encoder_layer(src_sbd, p, *, heads, attn_mode, local_attn_ctx, blocksize):
    src = jnp.transpose(src_sbd, (1, 0, 2))                 # (B, S, D)
    n_ctx = src.shape[1]
    q = k = v = src
    if attn_mode == "strided":
        q = _ref_strided_transpose(src, n_ctx, local_attn_ctx, blocksize)
        k, v = q, q
    scale = 1.0 / math.sqrt(src.shape[-1] // heads)
    w = jnp.einsum("bqd,bkd->bqk", q, k)
    w = jax.nn.softmax(w * scale, axis=-1)
    a = jnp.einsum("bqk,bkd->bqd", w, v)
    if attn_mode == "strided":
        n, t, embd = a.shape
        bT_ctx = n_ctx // local_attn_ctx
        a = a.reshape(n, local_attn_ctx, bT_ctx, embd).transpose(0, 2, 1, 3).reshape(n, t, embd)
    x = src + a                                             # dropout1 = identity
    x = _ref_layernorm(x, p["g1"][0], p["bt1"][0])
    y = jnp.maximum(x @ p["w1"] + p["b1"][0], 0.0) @ p["w2"] + p["b2"][0]
    x = _ref_layernorm(x + y, p["g2"][0], p["bt2"][0])      # dropout2 = identity
    return jnp.transpose(x, (1, 0, 2))


def reference_model(tokens, p, *, heads, attn_mode, local_attn_ctx=None,
                    blocksize=32, num_layers=1):
    x = p["emb"][tokens]
    x = x.reshape(x.shape[0], -1, x.shape[-1])
    S = x.shape[1]
    x = x + p["pe"][None, :S, :]
    src = jnp.transpose(x, (1, 0, 2))                       # (S, B, D)
    for _ in range(num_layers):
        src = _ref_encoder_layer(src, p, heads=heads, attn_mode=attn_mode,
                                 local_attn_ctx=local_attn_ctx, blocksize=blocksize)
    pooled = jnp.mean(src, axis=0)
    return pooled @ p["cls_w"] + p["cls_b"]


if __name__ == "__main__":
    d_model, heads, dim_feedforward, num_layers = 32, 4, 32, 1
    key = jax.random.PRNGKey(0)
    k_tok, k_par, k_tok2 = jax.random.split(key, 3)
    params = init_params(k_par, d_model, dim_feedforward)

    # Tolerance is set for bf16 MXU operands (f32 accumulation) vs f32 reference.
    ATOL = RTOL = 3e-2

    # --- small shapes: single-step fast path, 'all' attention ---------------
    B, T = 2, 16
    tokens = jax.random.randint(k_tok, (B, T), 0, 512, dtype=jnp.int32)

    fwd_all = jax.jit(functools.partial(model_forward, heads=heads,
                                        attn_mode="all", num_layers=num_layers))
    out = jax.block_until_ready(fwd_all(tokens, params))
    ref = reference_model(tokens, params, heads=heads, attn_mode="all",
                          num_layers=num_layers)
    assert out.shape == (B, 2)
    assert jnp.allclose(out, ref, atol=ATOL, rtol=RTOL), (
        f"mismatch vs reference ('all'): max|d|={jnp.max(jnp.abs(out - ref))}")

    # --- 'strided' attention mode (bT_ctx = 4, blocksize = 4) ----------------
    fwd_str = jax.jit(functools.partial(model_forward, heads=heads,
                                        attn_mode="strided", local_attn_ctx=4,
                                        blocksize=4, num_layers=num_layers))
    out_s = jax.block_until_ready(fwd_str(tokens, params))
    ref_s = reference_model(tokens, params, heads=heads, attn_mode="strided",
                            local_attn_ctx=4, blocksize=4, num_layers=num_layers)
    assert jnp.allclose(out_s, ref_s, atol=ATOL, rtol=RTOL), (
        f"mismatch vs reference ('strided'): max|d|={jnp.max(jnp.abs(out_s - ref_s))}")

    # --- longer sequence: exercises the flash (online-softmax) path ----------
    B2, T2 = 2, 512
    tokens2 = jax.random.randint(k_tok2, (B2, T2), 0, 512, dtype=jnp.int32)
    out2 = jax.block_until_ready(fwd_all(tokens2, params))
    ref2 = reference_model(tokens2, params, heads=heads, attn_mode="all",
                           num_layers=num_layers)
    assert jnp.allclose(out2, ref2, atol=ATOL, rtol=RTOL), (
        f"mismatch vs reference (flash path): max|d|={jnp.max(jnp.abs(out2 - ref2))}")

    print("KERNEL_OK")
</pallas_src>

<mosaic_0001>
module attributes {stable_mosaic.version = 11 : i64} {
  func.func @_single_step_kernel(%arg0: i32, %arg1: i32, %arg2: memref<1x16x32xf32, #tpu.memory_space<vmem>>, %arg3: memref<1x16x32xf32, #tpu.memory_space<vmem>>, %arg4: memref<16x32xf32, #tpu.memory_space<vmem>>, %arg5: memref<16x32xf32, #tpu.memory_space<vmem>>, %arg6: memref<32x32xbf16, #tpu.memory_space<vmem>>, %arg7: memref<1x32xf32, #tpu.memory_space<vmem>>, %arg8: memref<32x32xbf16, #tpu.memory_space<vmem>>, %arg9: memref<1x32xf32, #tpu.memory_space<vmem>>, %arg10: memref<1x32xf32, #tpu.memory_space<vmem>>, %arg11: memref<1x32xf32, #tpu.memory_space<vmem>>, %arg12: memref<1x32xf32, #tpu.memory_space<vmem>>, %arg13: memref<1x32xf32, #tpu.memory_space<vmem>>, %arg14: memref<1x16x32xf32, #tpu.memory_space<vmem>>, %arg15: memref<1x1x8x32xf32, #tpu.memory_space<vmem>>) attributes {dimension_semantics = [#tpu.dimension_semantics<parallel>, #tpu.dimension_semantics<parallel>], iteration_bounds = array<i64: 2, 1>, scalar_prefetch = 0 : i64, scratch_operands = 0 : i64, tpu.core_type = #tpu.core_type<tc>, window_params = [{transform_indices = @transform_0, window_bounds = array<i64: 1, 16, 32>}, {transform_indices = @transform_1, window_bounds = array<i64: 1, 16, 32>}, {transform_indices = @transform_2, window_bounds = array<i64: 16, 32>}, {pipeline_mode = #tpu.pipeline_mode<synchronous>, transform_indices = @transform_3, window_bounds = array<i64: 16, 32>}, {pipeline_mode = #tpu.pipeline_mode<synchronous>, transform_indices = @transform_4, window_bounds = array<i64: 32, 32>}, {pipeline_mode = #tpu.pipeline_mode<synchronous>, transform_indices = @transform_5, window_bounds = array<i64: 1, 32>}, {pipeline_mode = #tpu.pipeline_mode<synchronous>, transform_indices = @transform_6, window_bounds = array<i64: 32, 32>}, {pipeline_mode = #tpu.pipeline_mode<synchronous>, transform_indices = @transform_7, window_bounds = array<i64: 1, 32>}, {pipeline_mode = #tpu.pipeline_mode<synchronous>, transform_indices = @transform_8, window_bounds = array<i64: 1, 32>}, {pipeline_mode = #tpu.pipeline_mode<synchronous>, transform_indices = @transform_9, window_bounds = array<i64: 1, 32>}, {pipeline_mode = #tpu.pipeline_mode<synchronous>, transform_indices = @transform_10, window_bounds = array<i64: 1, 32>}, {pipeline_mode = #tpu.pipeline_mode<synchronous>, transform_indices = @transform_11, window_bounds = array<i64: 1, 32>}, {transform_indices = @transform_12, window_bounds = array<i64: 1, 16, 32>}, {transform_indices = @transform_13, window_bounds = array<i64: 1, 1, 8, 32>}]} {
    %c0 = arith.constant 0 : index
    %c0_0 = arith.constant 0 : index
    %c0_1 = arith.constant 0 : index
    %0 = vector.load %arg2[%c0, %c0_0, %c0_1] : memref<1x16x32xf32, #tpu.memory_space<vmem>>, vector<1x16x32xf32>
    %1 = vector.shape_cast %0 : vector<1x16x32xf32> to vector<16x32xf32>
    %c0_2 = arith.constant 0 : index
    %c0_3 = arith.constant 0 : index
    %c0_4 = arith.constant 0 : index
    %2 = vector.load %arg3[%c0_2, %c0_3, %c0_4] : memref<1x16x32xf32, #tpu.memory_space<vmem>>, vector<1x16x32xf32>
    %3 = vector.shape_cast %2 : vector<1x16x32xf32> to vector<16x32xf32>
    %c0_5 = arith.constant 0 : index
    %c0_6 = arith.constant 0 : index
    %4 = vector.load %arg4[%c0_5, %c0_6] : memref<16x32xf32, #tpu.memory_space<vmem>>, vector<16x32xf32>
    %5 = arith.addf %1, %4 : vector<16x32xf32>
    %c0_7 = arith.constant 0 : index
    %c0_8 = arith.constant 0 : index
    %6 = vector.load %arg5[%c0_7, %c0_8] : memref<16x32xf32, #tpu.memory_space<vmem>>, vector<16x32xf32>
    %7 = arith.addf %3, %6 : vector<16x32xf32>
    %cst = arith.constant 0.353553385 : f32
    %8 = vector.broadcast %cst : f32 to vector<16x32xf32>
    %9 = arith.mulf %5, %8 : vector<16x32xf32>
    %10 = arith.truncf %9 : vector<16x32xf32> to vector<16x32xbf16>
    %11 = arith.truncf %7 : vector<16x32xf32> to vector<16x32xbf16>
    %cst_9 = arith.constant dense<0.000000e+00> : vector<16x16xf32>
    %12 = tpu.matmul %10, %11, %cst_9 {dimension_numbers = #tpu.dot_dimension_numbers<[1], [1], [0], [0], [0, 0, 1, 0], [], []>} : vector<16x32xbf16>, vector<16x32xbf16>, vector<16x16xf32> -> vector<16x16xf32>
    %cst_10 = arith.constant dense<0xFF800000> : vector<16xf32>
    %13 = vector.multi_reduction <maximumf>, %12, %cst_10 [1] : vector<16x16xf32> to vector<16xf32>
    %14 = vector.shape_cast %13 : vector<16xf32> to vector<16x1xf32>
    %15 = vector.broadcast %14 : vector<16x1xf32> to vector<16x16xf32>
    %16 = arith.subf %12, %15 : vector<16x16xf32>
    %17 = math.exp %16 : vector<16x16xf32>
    %cst_11 = arith.constant dense<0.000000e+00> : vector<16xf32>
    %18 = vector.multi_reduction <add>, %17, %cst_11 [1] : vector<16x16xf32> to vector<16xf32>
    %19 = vector.shape_cast %18 : vector<16xf32> to vector<16x1xf32>
    %20 = arith.truncf %17 : vector<16x16xf32> to vector<16x16xbf16>
    %cst_12 = arith.constant dense<0.000000e+00> : vector<16x32xf32>
    %21 = tpu.matmul %20, %11, %cst_12 {dimension_numbers = #tpu.dot_dimension_numbers<[1], [0], [0], [1], [0, 0, 1, 1], [], []>} : vector<16x16xbf16>, vector<16x32xbf16>, vector<16x32xf32> -> vector<16x32xf32>
    %22 = tpu.reciprocal %19 {approx = true} : vector<16x1xf32> -> vector<16x1xf32>
    %23 = vector.broadcast %22 : vector<16x1xf32> to vector<16x32xf32>
    %24 = arith.mulf %21, %23 : vector<16x32xf32>
    %25 = arith.addf %5, %24 : vector<16x32xf32>
    %cst_13 = arith.constant dense<0.000000e+00> : vector<16xf32>
    %26 = vector.multi_reduction <add>, %25, %cst_13 [1] : vector<16x32xf32> to vector<16xf32>
    %27 = vector.shape_cast %26 : vector<16xf32> to vector<16x1xf32>
    %cst_14 = arith.constant 3.200000e+01 : f32
    %28 = vector.broadcast %cst_14 : f32 to vector<16x1xf32>
    %29 = arith.divf %27, %28 : vector<16x1xf32>
    %30 = vector.broadcast %29 : vector<16x1xf32> to vector<16x32xf32>
    %31 = arith.subf %25, %30 : vector<16x32xf32>
    %32 = arith.mulf %31, %31 : vector<16x32xf32>
    %cst_15 = arith.constant dense<0.000000e+00> : vector<16xf32>
    %33 = vector.multi_reduction <add>, %32, %cst_15 [1] : vector<16x32xf32> to vector<16xf32>
    %34 = vector.shape_cast %33 : vector<16xf32> to vector<16x1xf32>
    %cst_16 = arith.constant 3.200000e+01 : f32
    %35 = vector.broadcast %cst_16 : f32 to vector<16x1xf32>
    %36 = arith.divf %34, %35 : vector<16x1xf32>
    %cst_17 = arith.constant 9.99999974E-6 : f32
    %37 = vector.broadcast %cst_17 : f32 to vector<16x1xf32>
    %38 = arith.addf %36, %37 : vector<16x1xf32>
    %39 = math.rsqrt %38 : vector<16x1xf32>
    %40 = vector.broadcast %39 : vector<16x1xf32> to vector<16x32xf32>
    %41 = arith.mulf %31, %40 : vector<16x32xf32>
    %c0_18 = arith.constant 0 : index
    %c0_19 = arith.constant 0 : index
    %42 = vector.load %arg10[%c0_18, %c0_19] : memref<1x32xf32, #tpu.memory_space<vmem>>, vector<1x32xf32>
    %43 = vector.broadcast %42 : vector<1x32xf32> to vector<16x32xf32>
    %44 = arith.mulf %41, %43 : vector<16x32xf32>
    %c0_20 = arith.constant 0 : index
    %c0_21 = arith.constant 0 : index
    %45 = vector.load %arg11[%c0_20, %c0_21] : memref<1x32xf32, #tpu.memory_space<vmem>>, vector<1x32xf32>
    %46 = vector.broadcast %45 : vector<1x32xf32> to vector<16x32xf32>
    %47 = arith.addf %44, %46 : vector<16x32xf32>
    %48 = arith.truncf %47 : vector<16x32xf32> to vector<16x32xbf16>
    %c0_22 = arith.constant 0 : index
    %c0_23 = arith.constant 0 : index
    %49 = vector.load %arg6[%c0_22, %c0_23] : memref<32x32xbf16, #tpu.memory_space<vmem>>, vector<32x32xbf16>
    %cst_24 = arith.constant dense<0.000000e+00> : vector<16x32xf32>
    %50 = tpu.matmul %48, %49, %cst_24 {dimension_numbers = #tpu.dot_dimension_numbers<[1], [0], [0], [1], [0, 0, 1, 1], [], []>} : vector<16x32xbf16>, vector<32x32xbf16>, vector<16x32xf32> -> vector<16x32xf32>
    %c0_25 = arith.constant 0 : index
    %c0_26 = arith.constant 0 : index
    %51 = vector.load %arg7[%c0_25, %c0_26] : memref<1x32xf32, #tpu.memory_space<vmem>>, vector<1x32xf32>
    %52 = vector.broadcast %51 : vector<1x32xf32> to vector<16x32xf32>
    %53 = arith.addf %50, %52 : vector<16x32xf32>
    %cst_27 = arith.constant 0.000000e+00 : f32
    %54 = vector.broadcast %cst_27 : f32 to vector<16x32xf32>
    %55 = arith.maximumf %53, %54 : vector<16x32xf32>
    %56 = arith.truncf %55 : vector<16x32xf32> to vector<16x32xbf16>
    %c0_28 = arith.constant 0 : index
    %c0_29 = arith.constant 0 : index
    %57 = vector.load %arg8[%c0_28, %c0_29] : memref<32x32xbf16, #tpu.memory_space<vmem>>, vector<32x32xbf16>
    %cst_30 = arith.constant dense<0.000000e+00> : vector<16x32xf32>
    %58 = tpu.matmul %56, %57, %cst_30 {dimension_numbers = #tpu.dot_dimension_numbers<[1], [0], [0], [1], [0, 0, 1, 1], [], []>} : vector<16x32xbf16>, vector<32x32xbf16>, vector<16x32xf32> -> vector<16x32xf32>
    %c0_31 = arith.constant 0 : index
    %c0_32 = arith.constant 0 : index
    %59 = vector.load %arg9[%c0_31, %c0_32] : memref<1x32xf32, #tpu.memory_space<vmem>>, vector<1x32xf32>
    %60 = vector.broadcast %59 : vector<1x32xf32> to vector<16x32xf32>
    %61 = arith.addf %58, %60 : vector<16x32xf32>
    %62 = arith.addf %47, %61 : vector<16x32xf32>
    %cst_33 = arith.constant dense<0.000000e+00> : vector<16xf32>
    %63 = vector.multi_reduction <add>, %62, %cst_33 [1] : vector<16x32xf32> to vector<16xf32>
    %64 = vector.shape_cast %63 : vector<16xf32> to vector<16x1xf32>
    %cst_34 = arith.constant 3.200000e+01 : f32
    %65 = vector.broadcast %cst_34 : f32 to vector<16x1xf32>
    %66 = arith.divf %64, %65 : vector<16x1xf32>
    %67 = vector.broadcast %66 : vector<16x1xf32> to vector<16x32xf32>
    %68 = arith.subf %62, %67 : vector<16x32xf32>
    %69 = arith.mulf %68, %68 : vector<16x32xf32>
    %cst_35 = arith.constant dense<0.000000e+00> : vector<16xf32>
    %70 = vector.multi_reduction <add>, %69, %cst_35 [1] : vector<16x32xf32> to vector<16xf32>
    %71 = vector.shape_cast %70 : vector<16xf32> to vector<16x1xf32>
    %cst_36 = arith.constant 3.200000e+01 : f32
    %72 = vector.broadcast %cst_36 : f32 to vector<16x1xf32>
    %73 = arith.divf %71, %72 : vector<16x1xf32>
    %cst_37 = arith.constant 9.99999974E-6 : f32
    %74 = vector.broadcast %cst_37 : f32 to vector<16x1xf32>
    %75 = arith.addf %73, %74 : vector<16x1xf32>
    %76 = math.rsqrt %75 : vector<16x1xf32>
    %77 = vector.broadcast %76 : vector<16x1xf32> to vector<16x32xf32>
    %78 = arith.mulf %68, %77 : vector<16x32xf32>
    %c0_38 = arith.constant 0 : index
    %c0_39 = arith.constant 0 : index
    %79 = vector.load %arg12[%c0_38, %c0_39] : memref<1x32xf32, #tpu.memory_space<vmem>>, vector<1x32xf32>
    %80 = vector.broadcast %79 : vector<1x32xf32> to vector<16x32xf32>
    %81 = arith.mulf %78, %80 : vector<16x32xf32>
    %c0_40 = arith.constant 0 : index
    %c0_41 = arith.constant 0 : index
    %82 = vector.load %arg13[%c0_40, %c0_41] : memref<1x32xf32, #tpu.memory_space<vmem>>, vector<1x32xf32>
    %83 = vector.broadcast %82 : vector<1x32xf32> to vector<16x32xf32>
    %84 = arith.addf %81, %83 : vector<16x32xf32>
    %c0_42 = arith.constant 0 : index
    %c0_43 = arith.constant 0 : index
    %c0_44 = arith.constant 0 : index
    %85 = vector.load %arg14[%c0_42, %c0_43, %c0_44] : memref<1x16x32xf32, #tpu.memory_space<vmem>>, vector<1x16x32xf32>
    %86 = vector.shape_cast %85 : vector<1x16x32xf32> to vector<16x32xf32>
    %87 = vector.shape_cast %84 : vector<16x32xf32> to vector<1x16x32xf32>
    tpu.vector_store %arg14[%c0_42, %c0_43, %c0_44], %87 {strides = array<i32>} : memref<1x16x32xf32, #tpu.memory_space<vmem>>, vector<1x16x32xf32>,
    %cst_45 = arith.constant dense<0.000000e+00> : vector<32xf32>
    %88 = vector.multi_reduction <add>, %84, %cst_45 [0] : vector<16x32xf32> to vector<32xf32>
    %89 = vector.shape_cast %88 : vector<32xf32> to vector<1x32xf32>
    %90 = vector.shape_cast %89 : vector<1x32xf32> to vector<1x1x32xf32>
    %91 = vector.shape_cast %90 : vector<1x1x32xf32> to vector<1x1x32xf32>
    %92 = vector.broadcast %91 : vector<1x1x32xf32> to vector<1x8x32xf32>
    %c0_46 = arith.constant 0 : index
    %c0_47 = arith.constant 0 : index
    %c0_48 = arith.constant 0 : index
    %c0_49 = arith.constant 0 : index
    %93 = vector.load %arg15[%c0_46, %c0_47, %c0_48, %c0_49] : memref<1x1x8x32xf32, #tpu.memory_space<vmem>>, vector<1x1x8x32xf32>
    %94 = vector.shape_cast %93 : vector<1x1x8x32xf32> to vector<1x8x32xf32>
    %95 = vector.shape_cast %92 : vector<1x8x32xf32> to vector<1x1x8x32xf32>
    tpu.vector_store %arg15[%c0_46, %c0_47, %c0_48, %c0_49], %95 {strides = array<i32>} : memref<1x1x8x32xf32, #tpu.memory_space<vmem>>, vector<1x1x8x32xf32>,
    return
  }
  func.func @transform_0(%arg0: i32, %arg1: i32) -> (i32, i32, i32) {
    %c0_i32 = arith.constant 0 : i32
    %c0_i32_0 = arith.constant 0 : i32
    return %arg0, %arg1, %c0_i32 : i32, i32, i32
  }
  func.func @transform_1(%arg0: i32, %arg1: i32) -> (i32, i32, i32) {
    %c0_i32 = arith.constant 0 : i32
    %c0_i32_0 = arith.constant 0 : i32
    %c0_i32_1 = arith.constant 0 : i32
    return %arg0, %c0_i32, %c0_i32_0 : i32, i32, i32
  }
  func.func @transform_2(%arg0: i32, %arg1: i32) -> (i32, i32) {
    %c0_i32 = arith.constant 0 : i32
    %c0_i32_0 = arith.constant 0 : i32
    return %arg1, %c0_i32 : i32, i32
  }
  func.func @transform_3(%arg0: i32, %arg1: i32) -> (i32, i32) {
    %c0_i32 = arith.constant 0 : i32
    %c0_i32_0 = arith.constant 0 : i32
    %c0_i32_1 = arith.constant 0 : i32
    return %c0_i32, %c0_i32_0 : i32, i32
  }
  func.func @transform_4(%arg0: i32, %arg1: i32) -> (i32, i32) {
    %c0_i32 = arith.constant 0 : i32
    %c0_i32_0 = arith.constant 0 : i32
    %c0_i32_1 = arith.constant 0 : i32
    return %c0_i32, %c0_i32_0 : i32, i32
  }
  func.func @transform_5(%arg0: i32, %arg1: i32) -> (i32, i32) {
    %c0_i32 = arith.constant 0 : i32
    %c0_i32_0 = arith.constant 0 : i32
    %c0_i32_1 = arith.constant 0 : i32
    return %c0_i32, %c0_i32_0 : i32, i32
  }
  func.func @transform_6(%arg0: i32, %arg1: i32) -> (i32, i32) {
    %c0_i32 = arith.constant 0 : i32
    %c0_i32_0 = arith.constant 0 : i32
    %c0_i32_1 = arith.constant 0 : i32
    return %c0_i32, %c0_i32_0 : i32, i32
  }
  func.func @transform_7(%arg0: i32, %arg1: i32) -> (i32, i32) {
    %c0_i32 = arith.constant 0 : i32
    %c0_i32_0 = arith.constant 0 : i32
    %c0_i32_1 = arith.constant 0 : i32
    return %c0_i32, %c0_i32_0 : i32, i32
  }
  func.func @transform_8(%arg0: i32, %arg1: i32) -> (i32, i32) {
    %c0_i32 = arith.constant 0 : i32
    %c0_i32_0 = arith.constant 0 : i32
    %c0_i32_1 = arith.constant 0 : i32
    return %c0_i32, %c0_i32_0 : i32, i32
  }
  func.func @transform_9(%arg0: i32, %arg1: i32) -> (i32, i32) {
    %c0_i32 = arith.constant 0 : i32
    %c0_i32_0 = arith.constant 0 : i32
    %c0_i32_1 = arith.constant 0 : i32
    return %c0_i32, %c0_i32_0 : i32, i32
  }
  func.func @transform_10(%arg0: i32, %arg1: i32) -> (i32, i32) {
    %c0_i32 = arith.constant 0 : i32
    %c0_i32_0 = arith.constant 0 : i32
    %c0_i32_1 = arith.constant 0 : i32
    return %c0_i32, %c0_i32_0 : i32, i32
  }
  func.func @transform_11(%arg0: i32, %arg1: i32) -> (i32, i32) {
    %c0_i32 = arith.constant 0 : i32
    %c0_i32_0 = arith.constant 0 : i32
    %c0_i32_1 = arith.constant 0 : i32
    return %c0_i32, %c0_i32_0 : i32, i32
  }
  func.func @transform_12(%arg0: i32, %arg1: i32) -> (i32, i32, i32) {
    %c0_i32 = arith.constant 0 : i32
    %c0_i32_0 = arith.constant 0 : i32
    return %arg0, %arg1, %c0_i32 : i32, i32, i32
  }
  func.func @transform_13(%arg0: i32, %arg1: i32) -> (i32, i32, i32, i32) {
    %c0_i32 = arith.constant 0 : i32
    %c0_i32_0 = arith.constant 0 : i32
    %c0_i32_1 = arith.constant 0 : i32
    return %arg0, %arg1, %c0_i32, %c0_i32_0 : i32, i32, i32, i32
  }
}

</mosaic_0001>

<bundles_post_ra>
// kernel: model_forward.1
= control target key start
LH: loop header
LB: loop body
LE: loop exit
PB: predicated region body
PF: predicated region fallthrough
CT: control target
= control target key end

     0   :  { %s1579_s0 = inlined_call_operand.vmem [shape: f32[2,16,32], index: 0, kind: input, shape index: {}, may-alias: {0,1}]   ;;  %s1580_s1 = inlined_call_operand.vmem [shape: f32[2,16,32], index: 1, kind: input, shape index: {}, may-alias: {0,1}]   ;;  %s1581_s2 = inlined_call_operand.vmem [shape: f32[16,32], index: 2, kind: input, shape index: {}, may-alias: {2,3}]   ;;  %s1582_s3 = inlined_call_operand.vmem [shape: f32[16,32], index: 3, kind: input, shape index: {}, may-alias: {2,3}]   ;;  %s1583_s4 = inlined_call_operand.vmem [shape: bf16[32,32], index: 4, kind: input, shape index: {}]   ;;  %s1584_s5 = inlined_call_operand.vmem [shape: f32[1,32], index: 5, kind: input, shape index: {}]   ;;  %s1585_s6 = inlined_call_operand.vmem [shape: bf16[32,32], index: 6, kind: input, shape index: {}]   ;;  %s1586_s7 = inlined_call_operand.vmem [shape: f32[1,32], index: 7, kind: input, shape index: {}]   ;;  %s1587_s8 = inlined_call_operand.vmem [shape: f32[1,32], index: 8, kind: input, shape index: {}]   ;;  %s1588_s9 = inlined_call_operand.vmem [shape: f32[1,32], index: 9, kind: input, shape index: {}]   ;;  %s1589_s10 = inlined_call_operand.vmem [shape: f32[1,32], index: 10, kind: input, shape index: {}]   ;;  %s1590_s11 = inlined_call_operand.vmem [shape: f32[1,32], index: 11, kind: input, shape index: {}]   ;;  %s1591_s12 = inlined_call_operand.hbm [shape: f32[2,16,32], index: 12, kind: output, shape index: {0}]   ;;  %s1592_s13 = inlined_call_operand.vmem [shape: f32[2,1,8,32], index: 13, kind: output, shape index: {1}]  }
   0x1   :  { %1601 = sst [smem:[#allocation13_spill]] %s1592_s13 }
   0x2   :  { %19 = vsyncpa [#allocation3], 0 }
   0x3   :  { %21 = vsyncpa [#allocation3 + $0x1], 0  ;;  %s1376_s25 = smov 0   ;;  %s1378_s26 = smov 0  }
   0x4   :  { %s1380_s27 = smov 0   ;;  %s1382_s28 = smov 0  }
   0x5   :  { %s1384_s29 = smov 0   ;;  %s1386_s30 = smov 0  }
   0x6 LB: > { %1602 = sst [smem:[#allocation5_spill]] %s1279_s25  ;;  %s1070_s14 = sadd.s32 4294967295, %s1299_s30   ;;  %s1299_s30 = sphi %s1386_s30, %s27_s30   ;;  %s1295_s29 = sphi %s1384_s29, %s1620_s29   ;;  %s1291_s28 = sphi %s1382_s28, %s1619_s28   ;;  %s1287_s27 = sphi %s1380_s27, %s1618_s27   ;;  %s1283_s26 = sphi %s1378_s26, %s1622_s26   ;;  %s1279_s25 = sphi %s1376_s25, %s1621_s25  }
   0x7   : > { %1603 = sst [smem:[#allocation6_spill]] %s1287_s27  ;;  %s1071_s15 = sadd.s32 4294967294, %s1299_s30  }
   0x8   : > { %1604 = sst [smem:[#allocation7_spill]] %s1295_s29  ;;  %s39_s16 = sadd.s32 1, %s1295_s29 }
   0x9   : > { %1605 = sst [smem:[#allocation8_spill]] %s1299_s30  ;;  %s317_s17 = sadd.s32 1, %s1287_s27 }
   0xa   : > { %p41_p0 = scmp.ge.s32.totalorder %s39_s16, 2  ;;  %p327_p1 = scmp.ne.s32.totalorder %s1287_s27, %s1283_s26 }
   0xb   : > { %p328_p2 = scmp.eq.s32.totalorder %s1070_s14, 1  ;;  %p333_p3 = scmp.ne.s32.totalorder %s1283_s26, %s1279_s25 }
   0xc   : > { %s1624_s16 = smov (%p41_p0, %s39_s16), 0  ;;  %p334_p5 = scmp.eq.s32.totalorder %s1071_s15, 1 }
   0xd   : > { %1606 = sst [smem:[#allocation9_spill]] %s1624_s16  ;;  %p1416_p4 = por %p328_p2, %p327_p1 }
   0xe   : > { %s312_s19 = ssub.s32 %s1295_s29, %s1624_s16  ;;  %p1075_p6 = scmp.ge.s32.totalorder %s1299_s30, 1 }
   0xf   : > { %p315_p7 = scmp.eq.s32.totalorder %s312_s19, 0  ;;  %p1423_p8 = por %p334_p5, %p333_p3 }
  0x10   : > { %p437_p9 = scmp.lt.s32.totalorder %s1299_s30, 3 }
  0x11   : > { %s1608_s20 = scalar_select %p1423_p8, 1, 0 }
  0x12   : > { %s1429_s21 = scalar_select %p315_p7, %s1287_s27, %s317_s17  }
  0x13   : > { %1609 = sst [smem:[#allocation10_spill]] %s1608_s20  ;;  %p438_p10 = pnand %p1075_p6, %p437_p9 }
  0x14   : > { %1610 = sst [smem:[#allocation11_spill]] %s1429_s21 }
  0x15   : > { %441 = sbr.rel (%p438_p10) target bundleno = 1735 (0x6c7), region = 68 }
  0x1c   : > { %p503_p11 = scmp.lt.s32.totalorder %s1291_s28, 1  ;;  %v1301_v0 = vmov 0.0   ;;  %vm1302_vm0 = vmmov 0   ;;  %v540_v1 = vld [vmem:[%s1582_s3] sm:$0xff]  ;;  %v537_v3 = vld [vmem:[%s1581_s2 + $0x8] sm:$0xff]  ;;  %vm548_vm1 = vcmask 261120  }
  0x1d   : > { %1114 = vmatprep.subr.bf16.mxu0 %v1301_v0  ;;  %1120 = vmatprep.subr.bf16.mxu1 %v1301_v0  ;;  %v536_v2 = vld [vmem:[%s1581_s2] sm:$0xff]  ;;  %v541_v4 = vld [vmem:[%s1582_s3 + $0x8] sm:$0xff]  ;;  %vm596_vm2 = vcmask 130048   ;;  %s490_s25 = sand.u32 1, %s1283_s26  }
  0x1e   : > { %s1435_s22 = scalar_select %p503_p11, %s1291_s28, 1  ;;  %1116 = vmatprep.mubr.msk.bf16.mxu0 %vm1302_vm0, %v1301_v0  ;;  %1122 = vmatprep.mubr.msk.bf16.mxu1 %vm1302_vm0, %v1301_v0  ;;  %v1201_v59 = vld [vmem:[%s1583_s4] sm:$0xff]   ;;  %v1202_v60 = vld [vmem:[%s1583_s4 + $0x8] sm:$0xff]  }
  0x1f   : > { %s1076_s27 = sshll.u32 %s490_s25, 4 }
  0x20   : > { %1611 = sst [smem:[#allocation12_spill]] %s1435_s22  ;;  %s1101_s23 = sshll.u32 %s1435_s22, 4 }
  0x21   : > { %s510_s19 = scalar_lea.vmem %s1579_s0, %s1101_s23  ;;  %s516_s21 = scalar_lea.vmem %s1580_s1, %s1101_s23 }
  0x22   : > { %v532_v5 = vld [vmem:[%s510_s19] sm:$0xff]  ;;  %v533_v6 = vld [vmem:[%s510_s19 + $0x8] sm:$0xff]  ;;  %s492_s22 = scalar_lea.vmem [#allocation2], %s1076_s27  ;;  %s1303_s19 = smov [#allocation2]  }
  0x23   : > { %v534_v7 = vld [vmem:[%s516_s21] sm:$0xff]  ;;  %v535_v8 = vld [vmem:[%s516_s21 + $0x8] sm:$0xff]  ;;  %v538_v10 = vadd.f32 %v536_v2, %v532_v5  ;;  %v539_v11 = vadd.f32 %v537_v3, %v533_v6  ;;  %s1103_s21 = sshll.u32 %s1291_s28, 8  ;;  %s930_s23 = sshll.u32 %s492_s22, 4  ;;  %s1522_s23 = int_to_ptr.vmem [resolvable:$true] %s930_s23 }
  0x24   : > { %v542_v9 = vadd.f32 %v540_v1, %v534_v7  ;;  %v543_v12 = vadd.f32 %v541_v4, %v535_v8  ;;  %v1084_v5 = vld [vmem:[%s1587_s8] ss:$0 sm:$0xff]  ;;  %s1520_s15 = scalar_lea.hbm %s1591_s12, %s1103_s21  ;;  %s1528_s28 = scalar_lea.sflag [#allocation3], %s490_s25 }
  0x25   : > { %v544_v15 = vmul.f32 0.35355338, %v538_v10  ;;  %v545_v16 = vmul.f32 0.35355338, %v539_v11  ;;  %s1221_s17 = scalar_lea.vmem %s1522_s23, 256  ;;  %s1225_s13 = sshll.u32 %s1303_s19, 4  ;;  %s1226_s13 = int_to_ptr.vmem [resolvable:$false] %s1225_s13 }
  0x26   : > { %v547_v13 = vpack.c.bf16 %v543_v12, %v542_v9  ;;  %p1222_p12 = scmp.ne.s32.totalorder %s1522_s23, %s1221_s17  ;;  %s1227_s27 = scalar_lea.vmem %s1226_s13, 512 }
  0x27   : > { %v546_v17 = vpack.c.bf16 %v545_v16, %v544_v15  ;;  %v1203_v15 = vld [vmem:[%s1585_s6] sm:$0xff]   ;;  %v1204_v16 = vld [vmem:[%s1585_s6 + $0x8] sm:$0xff]   ;;  %p1228_p1 = scmp.lt.s32.totalorder %s1522_s23, %s1226_s13  ;;  %p1229_p2 = scmp.lt.s32.totalorder %s1227_s27, %s1221_s17 }
  0x28   : > { %v553_v14 = vsel %vm548_vm1, %v547_v13, 0  ;;  %1121 = vmatpush3.bf16.msra.mxu1 %v547_v13  ;;  %p1223_p13 = pnand %p1222_p12, %p1416_p4 }
  0x29   : > { %1115 = vmatpush3.bf16.xpose.msra.mxu0 %v553_v14  ;;  %1126 = vmatprep.subr.bf16.mxu1 %v1301_v0  ;;  %p1230_p3 = por %p1229_p2, %p1228_p1 }
  0x2a   : > { %1134 = vmatprep.subr.bf16.mxu0 %v1301_v0  ;;  %p1224_p0 = pneg %p1223_p13 }
  0x2c   : > { %p1231_p5 = pnand %p1230_p3, %p1224_p0 }
  0x30   : > { %1117 = vmatmul.mubr.msk.bf16.vlgmr.msra.gmra.mrb[0].mxu0 %vm548_vm1, %v546_v17  ;;  %v1086_v17 = vld [vmem:[%s1584_s5] ss:$0 sm:$0xff] }
  0x31   : > { %1138 = vmatprep.mubr.msk.bf16.mxu0 %vm1302_vm0, %v1301_v0  ;;  %1135 = vmatpush3.bf16.msra.mxu0 %v1203_v15 }
  0x32   : > { %1136 = vmatprep.subr.bf16.mxu0 %v1301_v0 }
  0x35   : > { %1137 = vmatpush3.bf16.msra.mxu0 %v1204_v16 }
 0x103   : > { %v589_v18 = vpop.f32.mrb[0].mxu0 }
 0x104   : > { %v1118_v19 = vpop.f32.mrb[1].mxu0  ;;  %v597_v20 = vsel %vm596_vm2, %v589_v18, -inf }
 0x105   : > { %598 = vmax.xlane.f32.xlu0 %v597_v20  ;;  %v592_v21 = vpop.f32.mrb[2].mxu0 }
 0x106   : > { %v1119_v22 = vpop.f32.mrb[3].mxu0  ;;  %v600_v23 = vsel %vm596_vm2, %v592_v21, -inf }
 0x109   : > { %601 = vmax.xlane.f32.xlu0 %v600_v23 }
 0x192   : > { %v599_v24 = vpop.xlane.xlu0 %598 }
 0x193   : > { %v603_v25 = vsub.f32 %v589_v18, %v599_v24 }
 0x195   : > { %v605_v26 = vmul.f32 1.442695, %v603_v25 }
 0x196   : > { %v602_v27 = vpop.xlane.xlu0 %601 }
 0x197   : > { %1205 = vpow2.f32 %v605_v26  ;;  %v604_v28 = vsub.f32 %v592_v21, %v602_v27 }
 0x199   : > { %v607_v29 = vmul.f32 1.442695, %v604_v28 }
 0x19b   : > { %1207 = vpow2.f32 %v607_v29 }
 0x1a1   : > { %v1206_v30 = vpop.eup %1205 }
 0x1a2   : > { %v609_v31 = vsel %vm596_vm2, %v1206_v30, 0.0 }
 0x1a3   : > { %610 = vadd.xlane.f32.xlu1 %v609_v31 }
 0x1a5   : > { %v1208_v32 = vpop.eup %1207 }
 0x1a6   : > { %v612_v33 = vsel %vm596_vm2, %v1208_v32, 0.0  ;;  %v615_v34 = vpack.c.bf16 %v1208_v32, %v1206_v30 }
 0x1a7   : > { %613 = vadd.xlane.f32.xlu1 %v612_v33 }
 0x1a8   : > { %1123 = vmatmul.mubr.msk.bf16.vlgmr.msra.gmra.mrb[0].mxu1 %vm596_vm2, %v615_v34 }
 0x1a9   : > { %1130 = vmatprep.mubr.msk.bf16.mxu1 %vm1302_vm0, %v1301_v0  ;;  %1127 = vmatpush3.bf16.msra.mxu1 %v1201_v59 }
 0x1aa   : > { %1128 = vmatprep.subr.bf16.mxu1 %v1301_v0  ;;  %v1090_v0 = vld [vmem:[%s1586_s7] ss:$0 sm:$0xff] }
 0x1ad   : > { %1129 = vmatpush3.bf16.msra.mxu1 %v1202_v60 }
 0x230   : > { %v611_v35 = vpop.xlane.xlu1 %610 }
 0x231   : > { %1209 = vrcp.f32 %v611_v35 }
 0x234   : > { %v614_v36 = vpop.xlane.xlu1 %613 }
 0x235   : > { %1211 = vrcp.f32 %v614_v36 }
 0x23b   : > { %v1210_v37 = vpop.eup %1209 }
 0x23f   : > { %v1212_v41 = vpop.eup %1211 }
 0x27b   : > { %v653_v38 = vpop.f32.mrb[0].mxu1 }
 0x27c   : > { %v662_v39 = vmul.f32 %v1210_v37, %v653_v38  ;;  %v1124_v40 = vpop.f32.mrb[1].mxu1 }
 0x27d   : > { %v656_v42 = vpop.f32.mrb[2].mxu1 }
 0x27e   : > { %v663_v43 = vmul.f32 %v1212_v41, %v656_v42  ;;  %v1125_v44 = vpop.f32.mrb[3].mxu1  ;;  %v664_v45 = vadd.f32 %v662_v39, %v538_v10  ;;  %v1085_v10 = vld [vmem:[%s1588_s9] ss:$0 sm:$0xff] }
 0x280   : > { %v666_v46 = vsel %vm548_vm1, %v664_v45, 0.0  ;;  %v665_v47 = vadd.f32 %v663_v43, %v539_v11 }
 0x281   : > { %667 = vadd.xlane.f32.xlu0 %v666_v46 }
 0x282   : > { %v669_v48 = vsel %vm548_vm1, %v665_v47, 0.0 }
 0x283   : > { %670 = vadd.xlane.f32.xlu1 %v669_v48 }
 0x30e   : > { %v668_v49 = vpop.xlane.xlu0 %667 }
 0x30f   : > { %v673_v50 = vmul.f32 0.03125, %v668_v49 }
 0x310   : > { %v671_v51 = vpop.xlane.xlu1 %670 }
 0x311   : > { %v675_v52 = vsub.f32 %v664_v45, %v673_v50  ;;  %v674_v53 = vmul.f32 0.03125, %v671_v51 }
 0x313   : > { %v676_v54 = vsub.f32 %v665_v47, %v674_v53  ;;  %v677_v55 = vmul.f32 %v675_v52, %v675_v52 }
 0x315   : > { %v679_v56 = vsel %vm548_vm1, %v677_v55, 0.0  ;;  %v678_v57 = vmul.f32 %v676_v54, %v676_v54 }
 0x316   : > { %680 = vadd.xlane.f32.xlu0 %v679_v56 }
 0x317   : > { %v682_v58 = vsel %vm548_vm1, %v678_v57, 0.0  ;;  %v1095_v57 = vld [vmem:[%s1590_s11] ss:$0 sm:$0xff] }
 0x318   : > { %683 = vadd.xlane.f32.xlu1 %v682_v58 }
 0x3a3   : > { %v681_v61 = vpop.xlane.xlu0 %680 }
 0x3a4   : > { %v685_v62 = vmul.f32 0.03125, %v681_v61 }
 0x3a5   : > { %v684_v63 = vpop.xlane.xlu1 %683 }
 0x3a6   : > { %v687_v1 = vadd.f32 1e-05, %v685_v62  ;;  %v686_v2 = vmul.f32 0.03125, %v684_v63 }
 0x3a8   : > { %1213 = vrsqrt.f32 %v687_v1  ;;  %v688_v3 = vadd.f32 1e-05, %v686_v2 }
 0x3aa   : > { %1215 = vrsqrt.f32 %v688_v3 }
 0x3b2   : > { %v1214_v4 = vpop.eup %1213 }
 0x3b3   : > { %v691_v6 = vmul.f32 %v1214_v4, %v675_v52 }
 0x3b4   : > { %v1216_v7 = vpop.eup %1215 }
 0x3b5   : > { %v700_v8 = vmul.f32 %v1084_v5, %v691_v6  ;;  %v692_v9 = vmul.f32 %v1216_v7, %v676_v54  ;;  %v1094_v54 = vld [vmem:[%s1589_s10] ss:$0 sm:$0xff] }
 0x3b7   : > { %v701_v11 = vmul.f32 %v1084_v5, %v692_v9  ;;  %v709_v12 = vadd.f32 %v1085_v10, %v700_v8 }
 0x3b9   : > { %v710_v13 = vadd.f32 %v1085_v10, %v701_v11 }
 0x3bb   : > { %v711_v14 = vpack.c.bf16 %v710_v13, %v709_v12 }
 0x3bd   : > { %1131 = vmatmul.mubr.msk.bf16.vlgmr.msra.gmra.mrb[4].mxu1 %vm548_vm1, %v711_v14 }
 0x490   : > { %v772_v18 = vpop.f32.mrb[4].mxu1 }
 0x491   : > { %v773_v19 = vadd.f32 %v1086_v17, %v772_v18  ;;  %v1132_v20 = vpop.f32.mrb[5].mxu1 }
 0x492   : > { %v775_v21 = vpop.f32.mrb[6].mxu1 }
 0x493   : > { %v776_v22 = vadd.f32 %v1086_v17, %v775_v21  ;;  %v1133_v23 = vpop.f32.mrb[7].mxu1  ;;  %v779_v24 = vmax.f32 %v773_v19, 0.0 }
 0x495   : > { %v780_v25 = vmax.f32 %v776_v22, 0.0 }
 0x497   : > { %v781_v26 = vpack.c.bf16 %v780_v25, %v779_v24 }
 0x499   : > { %1139 = vmatmul.mubr.msk.bf16.vlgmr.msra.gmra.mrb[4].mxu0 %vm548_vm1, %v781_v26 }
 0x56c   : > { %v842_v27 = vpop.f32.mrb[4].mxu0 }
 0x56d   : > { %v843_v28 = vadd.f32 %v1090_v0, %v842_v27  ;;  %v1140_v29 = vpop.f32.mrb[5].mxu0 }
 0x56e   : > { %v845_v30 = vpop.f32.mrb[6].mxu0 }
 0x56f   : > { %v846_v31 = vadd.f32 %v1090_v0, %v845_v30  ;;  %v1141_v32 = vpop.f32.mrb[7].mxu0  ;;  %v849_v33 = vadd.f32 %v843_v28, %v709_v12 }
 0x571   : > { %v851_v34 = vsel %vm548_vm1, %v849_v33, 0.0  ;;  %v850_v35 = vadd.f32 %v846_v31, %v710_v13 }
 0x572   : > { %852 = vadd.xlane.f32.xlu0 %v851_v34 }
 0x573   : > { %v854_v36 = vsel %vm548_vm1, %v850_v35, 0.0 }
 0x574   : > { %855 = vadd.xlane.f32.xlu1 %v854_v36 }
 0x5ff   : > { %v853_v37 = vpop.xlane.xlu0 %852 }
 0x600   : > { %v857_v38 = vmul.f32 0.03125, %v853_v37 }
 0x601   : > { %v856_v39 = vpop.xlane.xlu1 %855 }
 0x602   : > { %v859_v40 = vsub.f32 %v849_v33, %v857_v38  ;;  %v858_v41 = vmul.f32 0.03125, %v856_v39 }
 0x604   : > { %v860_v42 = vsub.f32 %v850_v35, %v858_v41  ;;  %v861_v43 = vmul.f32 %v859_v40, %v859_v40 }
 0x606   : > { %v863_v44 = vsel %vm548_vm1, %v861_v43, 0.0  ;;  %v862_v45 = vmul.f32 %v860_v42, %v860_v42 }
 0x607   : > { %864 = vadd.xlane.f32.xlu0 %v863_v44 }
 0x608   : > { %v866_v46 = vsel %vm548_vm1, %v862_v45, 0.0 }
 0x609   : > { %867 = vadd.xlane.f32.xlu1 %v866_v46 }
 0x694   : > { %v865_v47 = vpop.xlane.xlu0 %864 }
 0x695   : > { %v869_v48 = vmul.f32 0.03125, %v865_v47 }
 0x696   : > { %v868_v49 = vpop.xlane.xlu1 %867 }
 0x697   : > { %v871_v50 = vadd.f32 1e-05, %v869_v48  ;;  %v870_v51 = vmul.f32 0.03125, %v868_v49 }
 0x699   : > { %1217 = vrsqrt.f32 %v871_v50  ;;  %v872_v52 = vadd.f32 1e-05, %v870_v51 }
 0x69b   : > { %1219 = vrsqrt.f32 %v872_v52 }
 0x6a3   : > { %v1218_v53 = vpop.eup %1217 }
 0x6a4   : > { %v875_v55 = vmul.f32 %v1218_v53, %v859_v40 }
 0x6a5   : > { %v1220_v56 = vpop.eup %1219 }
 0x6a6   : > { %v884_v58 = vmul.f32 %v1094_v54, %v875_v55  ;;  %v876_v59 = vmul.f32 %v1220_v56, %v860_v42 }
 0x6a8   : > { %v893_v60 = vadd.f32 %v1095_v57, %v884_v58  ;;  %v885_v61 = vmul.f32 %v1094_v54, %v876_v59 }
 0x6aa   : > { %v894_v62 = vadd.f32 %v1095_v57, %v885_v61  ;;  %895 = vst.msk [vmem:[%s492_s22] sm:$0xff] %vm548_vm1, %v893_v60  ;;  %v897_v63 = vsel %vm548_vm1, %v893_v60, 0.0 }
 0x6ac   : > { %v898_v1 = vsel %vm548_vm1, %v894_v62, 0.0  ;;  %896 = vst.msk [vmem:[%s492_s22 + $0x8] sm:$0xff] %vm548_vm1, %v894_v62 }
 0x6ad   : > { %v899_v2 = vadd.f32 %v898_v1, %v897_v63 }
 0x6ae   : > { %1234 = shalt.err (!%p1231_p5)
}
 0x6af   : > { %s1235_s25 = scalar_lea.hbm %s1520_s15, 256  ;;  %s1239_s16 = scalar_lea.hbm %s1591_s12, 512 }
 0x6b0   : > { %p1236_p6 = scmp.ne.s32.totalorder %s1520_s15, %s1235_s25  ;;  %p1240_p10 = scmp.lt.u32.totalorder %s1520_s15, %s1591_s12 }
 0x6b1   : > { %p1241_p11 = scmp.lt.u32.totalorder %s1239_s16, %s1235_s25  ;;  %p1243_p13 = scmp.lt.u32.totalorder %s1235_s25, %s1520_s15 }
 0x6b2   : > { %p1237_p7 = pnand %p1236_p6, %p1416_p4 }
 0x6b3   : > { %p1242_p12 = por %p1241_p11, %p1240_p10 }
 0x6b4   : > { %p1238_p9 = pneg %p1237_p7 }
 0x6b5   : > { %p1244_p0 = por %p1243_p13, %p1242_p12 }
 0x6b7   : > { %p1245_p1 = pnand %p1244_p0, %p1238_p9 }
 0x6b9   : > { %1248 = shalt.err (!%p1245_p1)
}
 0x6ba   : > { %s1304_s22 = smov 128   ;;  %s1612_s24 = sld [smem:[#allocation12_spill]]  ;;  %v900_v3 = vrot.slane %v899_v2, 4 }
 0x6bb   : > { %s1305_s14 = smov 8   ;;  %s1613_s27 = sld [smem:[#allocation13_spill]] }
 0x6bc   : > { %1142 = dma.vmem_to_hbm [thread:$0]  (%p1416_p4), %s1522_s23, 256, %s1520_s15, %s1528_s28, %s1304_s22, %s1304_s22, %s1305_s14   ;;  %v901_v4 = vadd.f32 %v900_v3, %v899_v2 }
 0x6be   : > { %v902_v5 = vrot.slane %v901_v4, 2 }
 0x6c0   : > { %s1081_s17 = sshll.u32 %s1612_s24, 3  ;;  %v903_v6 = vadd.f32 %v902_v5, %v901_v4 }
 0x6c1   : > { %s530_s25 = scalar_lea.vmem %s1613_s27, %s1081_s17 }
 0x6c2   : > { %v904_v7 = vrot.slane %v903_v6, 1 }
 0x6c4   : > { %v905_v8 = vadd.f32 %v904_v7, %v903_v6 }
 0x6c6   : > { %906 = vst.msk [vmem:[%s530_s25] sm:$0xff] %vm548_vm1, %v905_v8 }
 0x6c7 PF: > { %s1614_s29 = sld [smem:[#allocation8_spill]]  ;;  %s1615_s30 = sld [smem:[#allocation5_spill]] }
 0x6cd   : > { %p1148_p2 = scmp.ge.s32.totalorder %s1614_s29, 2  ;;  %s948_s18 = sand.u32 1, %s1615_s30  }
 0x6ce   : > { %s949_s23 = scalar_lea.sflag [#allocation3], %s948_s18 }
 0x6cf   : > { %p1145_p4 = pnand %p1148_p2, %p1423_p8 }
 0x6d1   : > { %1274 = dma.done.wait (!%p1145_p4), %s949_s23, 256  }
 0x6d2   : > { %1276 = vsyncadd (!%p1145_p4), %s949_s23, 4294967040  ;;  %s27_s30 = sadd.s32 1, %s1614_s29   ;;  %s1617_s15 = sld [smem:[#allocation6_spill]] }
 0x6d3   : > { %p24_p3 = scmp.ge.s32.totalorder %s27_s30, 4   ;;  %s1618_s27 = sld [smem:[#allocation11_spill]] }
 0x6d4   : > { %s1619_s28 = sld [smem:[#allocation7_spill]]  ;;  %s1620_s29 = sld [smem:[#allocation9_spill]] }
 0x6d5   : > { %s1621_s25 = smov %s1283_s26  ;;  %26 = sbr.rel (!%p24_p3) target bundleno = 6 (0x6), region = 121 }
 0x6d8   : > { %s1622_s26 = smov %s1617_s15 }
 0x6dc   :  { %964 = vsyncpa [#allocation3], 1 }
 0x6dd   :  { %966 = vsyncpa [#allocation3 + $0x1], 1 }

</bundles_post_ra>
